<compile_context>
chip_gen: v5e
topology: v5e:2x2
jax: 0.10.0
libtpu: 0.0.40
codegen_flags: <defaults>
</compile_context>

<pallas_src>
import math
import functools

import jax
import jax.numpy as jnp
from jax import lax
from jax.experimental import pallas as pl
from jax.experimental.pallas import tpu as pltpu


# ----------------------------------------------------------------------------
# Kernel
# ----------------------------------------------------------------------------
def _ffn_kernel(x_ref, w1ag_ref, b1ag_ref, w2_ref, b2_ref, o_ref, acc_ref):
    # x_ref:    (tm, H)                w1ag_ref: (H, 2*tn)   [a_j | g_j] columns
    # b1ag_ref: (1, 2*tn)              w2_ref:   (tn, H)     b2_ref: (1, H)
    # o_ref:    (tm, H)                acc_ref:  (tm, H) f32 scratch, resident
    #                                            across the j (reduction) axis.
    j = pl.program_id(1)

    @pl.when(j == 0)
    def _():
        acc_ref[...] = jnp.zeros_like(acc_ref)

    x = x_ref[...]  # native dtype straight to the MXU, accumulate in f32

    # Single dot covers both the "a" and "gate" halves of this j-tile.
    ag = jnp.dot(x, w1ag_ref[...], preferred_element_type=jnp.float32)
    ag = ag + b1ag_ref[...].astype(jnp.float32)
    tn = ag.shape[-1] // 2          # static; multiple of 128 (lane-aligned slice)
    a = ag[:, :tn]
    g = ag[:, tn:]

    # Exact GELU (erf-based) to match torch.nn.functional.gelu's default.
    gelu_g = 0.5 * g * (1.0 + lax.erf(g * (1.0 / math.sqrt(2.0))))
    inter = (a * gelu_g).astype(w2_ref.dtype)   # back to native dtype for the MXU

    acc_ref[...] += jnp.dot(inter, w2_ref[...], preferred_element_type=jnp.float32)

    @pl.when(j == pl.num_programs(1) - 1)
    def _():
        out = acc_ref[...] + b2_ref[...].astype(jnp.float32)
        o_ref[...] = out.astype(o_ref.dtype)


# ----------------------------------------------------------------------------
# Tiling / VMEM heuristics (generation aware)
# ----------------------------------------------------------------------------
def _round_up(n, m):
    return ((n + m - 1) // m) * m


def _vmem_capacity_bytes():
    try:
        return int(pltpu.get_tpu_info().vmem_capacity_bytes)
    except Exception:
        return 64 << 20  # conservative fallback: v7x per-TensorCore VMEM


def _vmem_budget_bytes():
    cap = _vmem_capacity_bytes()
    # Leave headroom for Mosaic internal scratch; ~108 MiB on 128 MiB chips,
    # ~52 MiB on 64 MiB (v7x) chips.
    return max(24 << 20, min(cap - (12 << 20), int(cap * 0.85)))


def _default_tn(H, w_itemsize, vmem_budget=None):
    """Tile of the 4H intermediate axis: biggest {1024,512,256,128} divisor of
    4H whose double-buffered weight tiles fit in half the VMEM budget."""
    F4 = 4 * H
    if vmem_budget is None:
        vmem_budget = _vmem_budget_bytes()
    tn = F4
    for cand in (1024, 512, 256, 128):
        if F4 % cand != 0:
            continue
        weight_tiles = 2 * (2 * cand * H + cand * H) * w_itemsize  # W1[a|g] + W2^T
        if weight_tiles <= vmem_budget // 2:
            tn = cand
            break
    return tn


def _select_tm(M, H, tn, x_itemsize, w_itemsize, vmem_budget, tm_max=1024):
    """Row tile: as large as VMEM allows (amortizes the per-row-tile weight
    stream), balanced over >=2 tiles when possible (v7x megacore)."""
    row_mult = 16 if x_itemsize == 2 else (32 if x_itemsize == 1 else 8)

    def footprint(tm):
        return (2 * tm * H * x_itemsize               # x tile (double-buffered)
                + 2 * tm * H * x_itemsize             # out tile (double-buffered)
                + tm * H * 4                          # f32 accumulator scratch
                + 2 * H * (2 * tn) * w_itemsize       # W1 [a|g] column tile
                + 2 * tn * H * w_itemsize             # W2^T row tile
                + 2 * 8 * (2 * tn + H) * w_itemsize)  # biases (sublane-padded)

    tm = min(_round_up(M, row_mult), _round_up(tm_max, row_mult))
    while tm > row_mult and footprint(tm) > vmem_budget:
        tm -= row_mult
    # Balance the row tiles (avoid near-2x padding waste on ragged M) and keep
    # the parallel i axis at extent >= 2 whenever M allows it.
    n_i = pl.cdiv(M, tm)
    if n_i == 1 and M > row_mult:
        n_i = 2
    tm = min(tm, _round_up(pl.cdiv(M, n_i), row_mult))
    return max(row_mult, tm)


# ----------------------------------------------------------------------------
# Parameter preparation (one-time, outside the forward path)
# ----------------------------------------------------------------------------
def prepare_params(w1, b1, w2, b2, *, tn=None, param_dtype=None):
    """Convert PyTorch-layout params (w1: (8H, H), b1: (8H,), w2: (H, 4H),
    b2: (H,)) into the kernel's [in, out], per-tile-interleaved layout.
    Call ONCE; the forward path then does zero weight reshuffling."""
    if param_dtype is not None:  # e.g. jnp.bfloat16 to double MXU throughput on v5e
        w1, b1, w2, b2 = (a.astype(param_dtype) for a in (w1, b1, w2, b2))
    F8, H = w1.shape
    F4 = F8 // 2
    assert w2.shape == (H, F4), "w2 must be (H, 4H)"
    if tn is None:
        tn = _default_tn(H, jnp.asarray(w1).dtype.itemsize)
    assert F4 % tn == 0
    n_j = F4 // tn

    w1t = w1.T                                   # (H, 8H): [:, :F4]=a, [:, F4:]=gate
    wa = w1t[:, :F4].reshape(H, n_j, tn)
    wg = w1t[:, F4:].reshape(H, n_j, tn)
    w1ag = jnp.concatenate([wa, wg], axis=-1).reshape(H, 2 * F4)   # per-tile [a_j|g_j]
    ba = b1[:F4].reshape(1, n_j, tn)
    bg = b1[F4:].reshape(1, n_j, tn)
    b1ag = jnp.concatenate([ba, bg], axis=-1).reshape(1, 2 * F4)

    return {
        "w1ag": w1ag,
        "b1ag": b1ag,
        "w2t": w2.T,                 # (4H, H)
        "b2": b2.reshape(1, H),      # (1, H)
        "tn": int(tn),
        "hidden": int(H),
    }


# ----------------------------------------------------------------------------
# Forward
# ----------------------------------------------------------------------------
@functools.partial(jax.jit, static_argnames=("tm", "tn", "vmem_limit"))
def _ffn_call(x2d, w1ag, b1ag, w2t, b2, *, tm, tn, vmem_limit):
    M, H = x2d.shape
    F4 = w2t.shape[0]
    grid_i = pl.cdiv(M, tm)
    M_pad = grid_i * tm
    if M_pad != M:
        x2d = jnp.pad(x2d, ((0, M_pad - M), (0, 0)))
    grid = (grid_i, F4 // tn)

    out2d = pl.pallas_call(
        _ffn_kernel,
        out_shape=jax.ShapeDtypeStruct((M_pad, H), x2d.dtype),
        grid_spec=pltpu.PrefetchScalarGridSpec(
            num_scalar_prefetch=0,
            grid=grid,
            in_specs=[
                pl.BlockSpec((tm, H), lambda i, j: (i, 0)),         # x rows
                pl.BlockSpec((H, 2 * tn), lambda i, j: (0, j)),     # W1 [a|g] columns
                pl.BlockSpec((1, 2 * tn), lambda i, j: (0, j)),     # b1 [a|g]
                pl.BlockSpec((tn, H), lambda i, j: (j, 0)),         # W2^T rows
                pl.BlockSpec((1, H), lambda i, j: (0, 0)),          # b2
            ],
            out_specs=pl.BlockSpec((tm, H), lambda i, j: (i, 0)),
            scratch_shapes=[pltpu.VMEM((tm, H), jnp.float32)],
        ),
        compiler_params=pltpu.CompilerParams(
            dimension_semantics=("parallel", "arbitrary"),
            vmem_limit_bytes=int(vmem_limit),
        ),
    )(x2d, w1ag, b1ag, w2t, b2)
    return out2d[:M]


def feed_forward_pallas(x, params, *, tm=None):
    """x: (..., H). `params` comes from prepare_params()."""
    H = params["hidden"]
    assert x.shape[-1] == H
    lead = x.shape[:-1]
    M = 1
    for d in lead:
        M *= int(d)
    x2d = x.reshape(M, H)

    tn = params["tn"]
    vmem_budget = _vmem_budget_bytes()
    if tm is None:
        tm = _select_tm(M, H, tn,
                        x2d.dtype.itemsize,
                        params["w1ag"].dtype.itemsize,
                        vmem_budget)

    out2d = _ffn_call(x2d, params["w1ag"], params["b1ag"], params["w2t"],
                      params["b2"], tm=int(tm), tn=int(tn),
                      vmem_limit=int(vmem_budget))
    return out2d.reshape(*lead, H)


# ----------------------------------------------------------------------------
# Init + pure-JAX reference (PyTorch semantics)
# ----------------------------------------------------------------------------
def init_params(key, hidden_size, dtype=jnp.float32):
    """Matches FeedForward.initialize(): trunc_normal(std=sqrt(2/(5H)),
    a=-2std, b=2std) for weights, zeros for biases (PyTorch layout)."""
    std = math.sqrt(2.0 / (5.0 * hidden_size))
    k1, k2 = jax.random.split(key)
    w1 = (jax.random.truncated_normal(
        k1, -2.0, 2.0, (hidden_size * 4 * 2, hidden_size)) * std).astype(dtype)
    b1 = jnp.zeros((hidden_size * 4 * 2,), dtype)
    w2 = (jax.random.truncated_normal(
        k2, -2.0, 2.0, (hidden_size, hidden_size * 4)) * std).astype(dtype)
    b2 = jnp.zeros((hidden_size,), dtype)
    return w1, b1, w2, b2


def feed_forward_ref(x, w1, b1, w2, b2):
    """Pure-JAX reference mirroring the PyTorch forward."""
    h = x @ w1.T + b1
    a, gate = jnp.split(h, 2, axis=-1)
    gelu_gate = 0.5 * gate * (1.0 + lax.erf(gate / math.sqrt(2.0)))
    inter = a * gelu_gate
    return inter @ w2.T + b2


if __name__ == "__main__":
    batch, seq, hidden = 2, 8, 32
    key = jax.random.PRNGKey(0)
    kx, kp = jax.random.split(key)

    x = jax.random.normal(kx, (batch, seq, hidden), jnp.float32)
    w1, b1, w2, b2 = init_params(kp, hidden)

    params = prepare_params(w1, b1, w2, b2)       # one-time layout conversion
    out = feed_forward_pallas(x, params)
    out = jax.block_until_ready(out)

    ref = feed_forward_ref(x, w1, b1, w2, b2)
    assert out.shape == (batch, seq, hidden)
    assert jnp.allclose(out, ref, atol=1e-5, rtol=1e-5), "mismatch vs reference"

    print("KERNEL_OK")
</pallas_src>

<mosaic_0001>
module attributes {stable_mosaic.version = 11 : i64} {
  func.func @_ffn_kernel(%arg0: i32, %arg1: i32, %arg2: memref<8x32xf32, #tpu.memory_space<vmem>>, %arg3: memref<32x256xf32, #tpu.memory_space<vmem>>, %arg4: memref<1x256xf32, #tpu.memory_space<vmem>>, %arg5: memref<128x32xf32, #tpu.memory_space<vmem>>, %arg6: memref<1x32xf32, #tpu.memory_space<vmem>>, %arg7: memref<8x32xf32, #tpu.memory_space<vmem>>, %arg8: memref<8x32xf32, #tpu.memory_space<vmem>>) attributes {dimension_semantics = [#tpu.dimension_semantics<parallel>, #tpu.dimension_semantics<arbitrary>], iteration_bounds = array<i64: 2, 1>, scalar_prefetch = 0 : i64, scratch_operands = 1 : i64, tpu.core_type = #tpu.core_type<tc>, window_params = [{transform_indices = @transform_0, window_bounds = array<i64: 8, 32>}, {transform_indices = @transform_1, window_bounds = array<i64: 32, 256>}, {transform_indices = @transform_2, window_bounds = array<i64: 1, 256>}, {transform_indices = @transform_3, window_bounds = array<i64: 128, 32>}, {pipeline_mode = #tpu.pipeline_mode<synchronous>, transform_indices = @transform_4, window_bounds = array<i64: 1, 32>}, {transform_indices = @transform_5, window_bounds = array<i64: 8, 32>}]} {
    %c0_i32 = arith.constant 0 : i32
    %0 = arith.cmpi eq, %arg1, %c0_i32 : i32
    %1 = arith.extui %0 : i1 to i32
    %c0_i32_0 = arith.constant 0 : i32
    %2 = arith.cmpi ne, %1, %c0_i32_0 : i32
    scf.if %2 {
      %cst_18 = arith.constant 0.000000e+00 : f32
      %28 = vector.broadcast %cst_18 : f32 to vector<8x32xf32>
      %c0_19 = arith.constant 0 : index
      %c0_20 = arith.constant 0 : index
      %29 = vector.load %arg8[%c0_19, %c0_20] : memref<8x32xf32, #tpu.memory_space<vmem>>, vector<8x32xf32>
      tpu.vector_store %arg8[%c0_19, %c0_20], %28 {strides = array<i32>} : memref<8x32xf32, #tpu.memory_space<vmem>>, vector<8x32xf32>,
    } else {
    }
    %c0 = arith.constant 0 : index
    %c0_1 = arith.constant 0 : index
    %3 = vector.load %arg2[%c0, %c0_1] : memref<8x32xf32, #tpu.memory_space<vmem>>, vector<8x32xf32>
    %c0_2 = arith.constant 0 : index
    %c0_3 = arith.constant 0 : index
    %4 = vector.load %arg3[%c0_2, %c0_3] : memref<32x256xf32, #tpu.memory_space<vmem>>, vector<32x256xf32>
    %cst = arith.constant dense<0.000000e+00> : vector<8x256xf32>
    %5 = tpu.matmul %3, %4, %cst {dimension_numbers = #tpu.dot_dimension_numbers<[1], [0], [0], [1], [0, 0, 1, 1], [], []>} : vector<8x32xf32>, vector<32x256xf32>, vector<8x256xf32> -> vector<8x256xf32>
    %c0_4 = arith.constant 0 : index
    %c0_5 = arith.constant 0 : index
    %6 = vector.load %arg4[%c0_4, %c0_5] : memref<1x256xf32, #tpu.memory_space<vmem>>, vector<1x256xf32>
    %7 = vector.broadcast %6 : vector<1x256xf32> to vector<8x256xf32>
    %8 = arith.addf %5, %7 : vector<8x256xf32>
    %9 = vector.extract_strided_slice %8 {offsets = [0, 0], sizes = [8, 128], strides = [1, 1]} : vector<8x256xf32> to vector<8x128xf32>
    %10 = vector.extract_strided_slice %8 {offsets = [0, 128], sizes = [8, 128], strides = [1, 1]} : vector<8x256xf32> to vector<8x128xf32>
    %cst_6 = arith.constant 5.000000e-01 : f32
    %11 = vector.broadcast %cst_6 : f32 to vector<8x128xf32>
    %12 = arith.mulf %11, %10 : vector<8x128xf32>
    %cst_7 = arith.constant 0.707106769 : f32
    %13 = vector.broadcast %cst_7 : f32 to vector<8x128xf32>
    %14 = arith.mulf %10, %13 : vector<8x128xf32>
    %15 = math.erf %14 : vector<8x128xf32>
    %cst_8 = arith.constant 1.000000e+00 : f32
    %16 = vector.broadcast %cst_8 : f32 to vector<8x128xf32>
    %17 = arith.addf %16, %15 : vector<8x128xf32>
    %18 = arith.mulf %12, %17 : vector<8x128xf32>
    %19 = arith.mulf %9, %18 : vector<8x128xf32>
    %c0_9 = arith.constant 0 : index
    %c0_10 = arith.constant 0 : index
    %20 = vector.load %arg8[%c0_9, %c0_10] : memref<8x32xf32, #tpu.memory_space<vmem>>, vector<8x32xf32>
    %c0_11 = arith.constant 0 : index
    %c0_12 = arith.constant 0 : index
    %21 = vector.load %arg5[%c0_11, %c0_12] : memref<128x32xf32, #tpu.memory_space<vmem>>, vector<128x32xf32>
    %cst_13 = arith.constant dense<0.000000e+00> : vector<8x32xf32>
    %22 = tpu.matmul %19, %21, %cst_13 {dimension_numbers = #tpu.dot_dimension_numbers<[1], [0], [0], [1], [0, 0, 1, 1], [], []>} : vector<8x128xf32>, vector<128x32xf32>, vector<8x32xf32> -> vector<8x32xf32>
    %23 = arith.addf %20, %22 : vector<8x32xf32>
    %c0_14 = arith.constant 0 : index
    %c0_15 = arith.constant 0 : index
    %24 = vector.load %arg8[%c0_14, %c0_15] : memref<8x32xf32, #tpu.memory_space<vmem>>, vector<8x32xf32>
    tpu.vector_store %arg8[%c0_14, %c0_15], %23 {strides = array<i32>} : memref<8x32xf32, #tpu.memory_space<vmem>>, vector<8x32xf32>,
    %c0_i32_16 = arith.constant 0 : i32
    %25 = arith.cmpi eq, %arg1, %c0_i32_16 : i32
    %26 = arith.extui %25 : i1 to i32
    %c0_i32_17 = arith.constant 0 : i32
    %27 = arith.cmpi ne, %26, %c0_i32_17 : i32
    scf.if %27 {
      %c0_18 = arith.constant 0 : index
      %c0_19 = arith.constant 0 : index
      %28 = vector.load %arg8[%c0_18, %c0_19] : memref<8x32xf32, #tpu.memory_space<vmem>>, vector<8x32xf32>
      %c0_20 = arith.constant 0 : index
      %c0_21 = arith.constant 0 : index
      %29 = vector.load %arg6[%c0_20, %c0_21] : memref<1x32xf32, #tpu.memory_space<vmem>>, vector<1x32xf32>
      %30 = vector.broadcast %29 : vector<1x32xf32> to vector<8x32xf32>
      %31 = arith.addf %28, %30 : vector<8x32xf32>
      %c0_22 = arith.constant 0 : index
      %c0_23 = arith.constant 0 : index
      %32 = vector.load %arg7[%c0_22, %c0_23] : memref<8x32xf32, #tpu.memory_space<vmem>>, vector<8x32xf32>
      tpu.vector_store %arg7[%c0_22, %c0_23], %31 {strides = array<i32>} : memref<8x32xf32, #tpu.memory_space<vmem>>, vector<8x32xf32>,
    } else {
    }
    return
  }
  func.func @transform_0(%arg0: i32, %arg1: i32) -> (i32, i32) {
    %c0_i32 = arith.constant 0 : i32
    %c0_i32_0 = arith.constant 0 : i32
    return %arg0, %c0_i32 : i32, i32
  }
  func.func @transform_1(%arg0: i32, %arg1: i32) -> (i32, i32) {
    %c0_i32 = arith.constant 0 : i32
    %c0_i32_0 = arith.constant 0 : i32
    return %c0_i32, %arg1 : i32, i32
  }
  func.func @transform_2(%arg0: i32, %arg1: i32) -> (i32, i32) {
    %c0_i32 = arith.constant 0 : i32
    %c0_i32_0 = arith.constant 0 : i32
    return %c0_i32, %arg1 : i32, i32
  }
  func.func @transform_3(%arg0: i32, %arg1: i32) -> (i32, i32) {
    %c0_i32 = arith.constant 0 : i32
    %c0_i32_0 = arith.constant 0 : i32
    return %arg1, %c0_i32 : i32, i32
  }
  func.func @transform_4(%arg0: i32, %arg1: i32) -> (i32, i32) {
    %c0_i32 = arith.constant 0 : i32
    %c0_i32_0 = arith.constant 0 : i32
    %c0_i32_1 = arith.constant 0 : i32
    return %c0_i32, %c0_i32_0 : i32, i32
  }
  func.func @transform_5(%arg0: i32, %arg1: i32) -> (i32, i32) {
    %c0_i32 = arith.constant 0 : i32
    %c0_i32_0 = arith.constant 0 : i32
    return %arg0, %c0_i32 : i32, i32
  }
}

</mosaic_0001>

<bundles_post_ra>
// kernel: _ffn_call.1
= control target key start
LH: loop header
LB: loop body
LE: loop exit
PB: predicated region body
PF: predicated region fallthrough
CT: control target
= control target key end

     0   :  { %10 = vsyncpa [#allocation4], 0  ;;  %s954_s0 = inlined_call_operand.vmem [shape: f32[16,32], index: 0, kind: input, shape index: {}]   ;;  %s955_s1 = inlined_call_operand.vmem [shape: f32[32,256], index: 1, kind: input, shape index: {}]   ;;  %s956_s2 = inlined_call_operand.vmem [shape: f32[1,256], index: 2, kind: input, shape index: {}]   ;;  %s957_s3 = inlined_call_operand.vmem [shape: f32[128,32], index: 3, kind: input, shape index: {}]   ;;  %s958_s4 = inlined_call_operand.vmem [shape: f32[1,32], index: 4, kind: input, shape index: {}]   ;;  %s959_s5 = inlined_call_operand.hbm [shape: f32[16,32], index: 5, kind: output, shape index: {}]  }
   0x1   :  { %12 = vsyncpa [#allocation4 + $0x1], 0  ;;  %s766_s18 = smov 0   ;;  %s768_s19 = smov 0  }
   0x2   :  { %s770_s20 = smov 0   ;;  %s772_s21 = smov 0  }
   0x3   :  { %s774_s22 = smov 0   ;;  %s776_s23 = smov 0  }
   0x4 LB: > { %s579_s24 = sadd.s32 4294967295, %s733_s23   ;;  %s580_s25 = sadd.s32 4294967294, %s733_s23   ;;  %s733_s23 = sphi %s776_s23, %s18_s23   ;;  %s729_s22 = sphi %s774_s22, %s966_s22   ;;  %s725_s21 = sphi %s772_s21, %s965_s21   ;;  %s721_s20 = sphi %s770_s20, %s964_s20   ;;  %s717_s19 = sphi %s768_s19, %s963_s19   ;;  %s713_s18 = sphi %s766_s18, %s962_s18  }
   0x5   : > { %s30_s26 = sadd.s32 1, %s729_s22  ;;  %s162_s27 = sadd.s32 1, %s721_s20 }
   0x6   : > { %p32_p0 = scmp.ge.s32.totalorder %s30_s26, 2  ;;  %p172_p1 = scmp.ne.s32.totalorder %s721_s20, %s717_s19 }
   0x7   : > { %p173_p2 = scmp.eq.s32.totalorder %s579_s24, 1  ;;  %p178_p3 = scmp.ne.s32.totalorder %s717_s19, %s713_s18 }
   0x8   : > { %s968_s26 = smov (%p32_p0, %s30_s26), 0  ;;  %p179_p5 = scmp.eq.s32.totalorder %s580_s25, 1 }
   0x9   : > { %p806_p4 = por %p173_p2, %p172_p1  ;;  %s159_s29 = ssub.s32 %s729_s22, %s968_s26 }
   0xa   : > { %p586_p6 = scmp.ge.s32.totalorder %s733_s23, 1  ;;  %p160_p7 = scmp.eq.s32.totalorder %s159_s29, 0 }
   0xb   : > { %p813_p8 = por %p179_p5, %p178_p3  ;;  %p233_p9 = scmp.lt.s32.totalorder %s733_s23, 3 }
   0xc   : > { %s819_s6 = scalar_select %p160_p7, %s721_s20, %s162_s27  }
   0xd   : > { %p234_p10 = pnand %p586_p6, %p233_p9 }
   0xe   : > { %p274_p11 = scmp.lt.s32.totalorder (!%p234_p10), %s725_s21, 1  ;;  %s593_s25 = sshll.u32 (!%p234_p10), %s725_s21, 3 }
   0xf   : > { %237 = sbr.rel (%p234_p10) target bundleno = 356 (0x164), region = 40 }
  0x14   : > { %v309_v0 = vld [vmem:[%s955_s1 + $0x38] sm:$0xff]  ;;  %v307_v1 = vld [vmem:[%s955_s1 + $0x28] sm:$0xff]  ;;  %v308_v2 = vld [vmem:[%s955_s1 + $0x30] sm:$0xff]  ;;  %s275_s17 = scalar_select %p274_p11, %s725_s21, 1  ;;  %vm299_vm0 = vcmask 261120   ;;  %v735_v47 = vmov 0.0  }
  0x15   : > { %352 = vmatpush.msra.mxu1 %v309_v0  ;;  %v306_v3 = vld [vmem:[%s955_s1 + $0x20] sm:$0xff]  ;;  %v305_v4 = vld [vmem:[%s955_s1 + $0x18] sm:$0xff]  ;;  %332 = vmatpush.msra.mxu0 %v308_v2  ;;  %v304_v5 = vld [vmem:[%s955_s1 + $0x10] sm:$0xff]  ;;  %300 = vst.msk [vmem:[#allocation2] sm:$0xff] %vm299_vm0, %v735_v47 }
  0x16   : > { %v303_v6 = vld [vmem:[%s955_s1 + $0x8] sm:$0xff]  ;;  %s588_s7 = sshll.u32 %s275_s17, 3  ;;  %v302_v7 = vld [vmem:[%s955_s1] sm:$0xff]  ;;  %v421_v9 = vld [vmem:[%s957_s3 + $0x78] sm:$0xff]  ;;  %s271_s17 = sand.u32 1, %s717_s19  }
  0x17   : > { %353 = vmatpush.msra.mxu1 %v307_v1  ;;  %333 = vmatpush.msra.mxu0 %v306_v3  ;;  %s277_s10 = scalar_lea.vmem %s954_s0, %s588_s7  ;;  %v858_v10 = vld [vmem:[%s956_s2] sm:$0x3]  ;;  %v420_v11 = vld [vmem:[%s957_s3 + $0x70] sm:$0xff]  ;;  %v419_v12 = vld [vmem:[%s957_s3 + $0x68] sm:$0xff]  ;;  %s587_s24 = sshll.u32 %s271_s17, 3 }
  0x18   : > { %v301_v8 = vld [vmem:[%s277_s10] sm:$0xff]  ;;  %422 = vmatpush.msra.mxu2 %v421_v9  ;;  %v313_v13 = vperm.slane %v858_v10, 1  ;;  %v417_v15 = vld [vmem:[%s957_s3 + $0x58] sm:$0xff]  ;;  %v416_v17 = vld [vmem:[%s957_s3 + $0x50] sm:$0xff]  ;;  %v312_v0 = vperm.slane %v858_v10, 0  ;;  %s465_s7 = scalar_lea.hbm %s959_s5, %s593_s25  ;;  %s273_s10 = scalar_lea.vmem [#allocation3], %s587_s24 }
  0x19   : > { %354 = vmatpush.msra.mxu1 %v305_v4  ;;  %334 = vmatpush.msra.mxu0 %v304_v5  ;;  %v418_v14 = vld [vmem:[%s957_s3 + $0x60] sm:$0xff]  ;;  %v415_v19 = vld [vmem:[%s957_s3 + $0x48] sm:$0xff]  ;;  %v413_v23 = vld [vmem:[%s957_s3 + $0x38] sm:$0xff]  ;;  %s467_s11 = sshll.u32 %s273_s10, 4  ;;  %s469_s12 = sshll.u32 %s465_s7, 4  ;;  %s468_s11 = int_to_ptr.vmem [resolvable:$true] %s467_s11  ;;  %s470_s12 = int_to_ptr.hbm [resolvable:$true] %s469_s12 }
  0x1a   : > { %423 = vmatpush.msra.mxu2 %v420_v11  ;;  %v414_v21 = vld [vmem:[%s957_s3 + $0x40] sm:$0xff]  ;;  %v412_v25 = vld [vmem:[%s957_s3 + $0x30] sm:$0xff]  ;;  %v411_v28 = vld [vmem:[%s957_s3 + $0x28] sm:$0xff]  ;;  %s455_s21 = scalar_lea.sflag [#allocation4], %s271_s17  ;;  %s669_s13 = sshra.s32 %s470_s12, 4  ;;  %s670_s13 = int_to_ptr.hbm [resolvable:$true] %s669_s13 }
  0x1b   : > { %355 = vmatpush.msra.mxu1 %v303_v6  ;;  %335 = vmatpush.msra.mxu0 %v302_v7  ;;  %v410_v31 = vld [vmem:[%s957_s3 + $0x20] sm:$0xff]  ;;  %v409_v34 = vld [vmem:[%s957_s3 + $0x18] sm:$0xff]  ;;  %v408_v37 = vld [vmem:[%s957_s3 + $0x10] sm:$0xff]  ;;  %s671_s14 = scalar_lea.hbm %s670_s13, 8  ;;  %s675_s24 = scalar_lea.hbm %s959_s5, 16 }
  0x1c   : > { %590 = vmatmul.msk.f32.vlgmr.msra.gmra.mxu1 %vm299_vm0, %v301_v8  ;;  %589 = vmatmul.msk.f32.vlgmr.msra.gmra.mxu0 %vm299_vm0, %v301_v8  ;;  %v407_v39 = vld [vmem:[%s957_s3 + $0x8] sm:$0xff]  ;;  %v406_v42 = vld [vmem:[%s957_s3] sm:$0xff]  ;;  %p672_p12 = scmp.ne.s32.totalorder %s670_s13, %s671_s14  ;;  %p676_p1 = scmp.lt.s32.totalorder %s670_s13, %s959_s5 }
  0x1d   : > { %424 = vmatpush.msra.mxu2 %v419_v12  ;;  %v405_v9 = vld [vmem:[#allocation2] sm:$0xff]  ;;  %p677_p2 = scmp.lt.s32.totalorder %s675_s24, %s671_s14 }
  0x1e   : > { %v652_v10 = vld [vmem:[%s958_s4] ss:$0 sm:$0xff]  ;;  %p673_p13 = pnand %p672_p12, %p806_p4 }
  0x1f   : > { %425 = vmatpush.msra.mxu2 %v418_v14  ;;  %p678_p3 = por %p677_p2, %p676_p1 }
  0x20   : > { %p674_p0 = pneg %p673_p13 }
  0x21   : > { %426 = vmatpush.msra.mxu2 %v417_v15 }
  0x22   : > { %p679_p5 = pnand %p678_p3, %p674_p0 }
  0x23   : > { %427 = vmatpush.msra.mxu2 %v416_v17 }
  0x25   : > { %428 = vmatpush.msra.mxu2 %v415_v19 }
  0x27   : > { %429 = vmatpush.msra.mxu2 %v414_v21 }
  0x29   : > { %430 = vmatpush.msra.mxu2 %v413_v23 }
  0x2b   : > { %431 = vmatpush.msra.mxu2 %v412_v25 }
  0x2d   : > { %432 = vmatpush.msra.mxu2 %v411_v28 }
  0x2f   : > { %433 = vmatpush.msra.mxu2 %v410_v31 }
  0x31   : > { %434 = vmatpush.msra.mxu2 %v409_v34 }
  0x33   : > { %435 = vmatpush.msra.mxu2 %v408_v37 }
  0x35   : > { %436 = vmatpush.msra.mxu2 %v407_v39 }
  0x37   : > { %437 = vmatpush.msra.mxu2 %v406_v42 }
  0x99   : > { %v357_v16 = vpop.f32.mrf.mxu1  ;;  %v337_v2 = vpop.f32.mrf.mxu0 }
  0x9a   : > { %v876_v18 = vadd.f32 %v357_v16, %v313_v13  ;;  %v338_v5 = vadd.f32 %v337_v2, %v312_v0 }
  0x9c   : > { %v361_v20 = vmul.f32 0.70710677, %v876_v18  ;;  %v360_v4 = vmul.f32 0.5, %v876_v18 }
  0x9e   : > { %v362_v22 = vmul.f32 %v361_v20, %v361_v20 }
  0xa0   : > { %v363_v24 = vmin.f32 %v362_v22, 16.0 }
  0xa2   : > { %v364_v26 = vmul.f32 2.1237322e-06, %v363_v24  ;;  %v375_v27 = vmul.f32 3.8918573e-05, %v363_v24 }
  0xa4   : > { %v365_v29 = vadd.f32 0.00028619796, %v364_v26  ;;  %v376_v30 = vadd.f32 0.001143296, %v375_v27 }
  0xa6   : > { %v366_v32 = vmul.f32 %v365_v29, %v363_v24  ;;  %v377_v33 = vmul.f32 %v376_v30, %v363_v24 }
  0xa8   : > { %v378_v35 = vadd.f32 0.014752088, %v377_v33  ;;  %v367_v36 = vadd.f32 0.0036580483, %v366_v32 }
  0xaa   : > { %v379_v38 = vmul.f32 %v378_v35, %v363_v24  ;;  %v368_v41 = vmul.f32 %v367_v36, %v363_v24 }
  0xac   : > { %v380_v40 = vadd.f32 0.112945676, %v379_v38  ;;  %v369_v45 = vadd.f32 0.05243302, %v368_v41 }
  0xae   : > { %v381_v43 = vmul.f32 %v380_v40, %v363_v24  ;;  %v370_v49 = vmul.f32 %v369_v45, %v363_v24 }
  0xb0   : > { %v382_v44 = vadd.f32 0.4994258, %v381_v43  ;;  %v371_v50 = vadd.f32 0.18741608, %v370_v49 }
  0xb2   : > { %v383_v46 = vmul.f32 %v382_v44, %v363_v24  ;;  %v372_v52 = vmul.f32 %v371_v50, %v363_v24 }
  0xb4   : > { %v384_v48 = vadd.f32 1.0, %v383_v46  ;;  %v373_v56 = vadd.f32 1.1283791, %v372_v52 }
  0xb6   : > { %653 = vrcp.f32 %v384_v48  ;;  %v396_v55 = vand.u32 2147483648, %v384_v48  ;;  %v394_v58 = vand.u32 2147483647, %v384_v48  ;;  %vm390_vm2 = vweird.f32 %v384_v48 }
  0xb7   : > { %v374_v61 = vmul.f32 %v373_v56, %v361_v20 }
  0xb8   : > { %v397_v60 = vor.u32 1.1754944e-38, %v396_v55  ;;  %vm395_vm4 = vcmp.eq.f32.partialorder %v394_v58, 8.507059e+37 }
  0xbc   : > { %v654_v51 = vpop.eup %653 }
  0xbd   : > { %v386_v53 = vmul.f32 %v654_v51, %v384_v48  ;;  %vm391_vm1 = vweird.f32 %v654_v51 }
  0xbe   : > { %vm392_vm3 = vmor %vm390_vm2, %vm391_vm1 }
  0xbf   : > { %v387_v54 = vsub.f32 1.0, %v386_v53 }
  0xc1   : > { %v388_v57 = vmul.f32 %v654_v51, %v387_v54 }
  0xc3   : > { %v389_v59 = vadd.f32 %v654_v51, %v388_v57 }
  0xc5   : > { %v393_v62 = vsel %vm392_vm3, %v654_v51, %v389_v59 }
  0xc6   : > { %v398_v63 = vsel %vm395_vm4, %v397_v60, %v393_v62 }
  0xc7   : > { %v399_v1 = vmul.f32 %v398_v63, %v374_v61 }
  0xc9   : > { %v591_v3 = vclamps-f32 %v399_v1, 1.0 }
  0xcb   : > { %v402_v6 = vadd.f32 1.0, %v591_v3 }
  0xcd   : > { %v403_v7 = vmul.f32 %v402_v6, %v360_v4 }
  0xcf   : > { %v404_v8 = vmul.f32 %v403_v7, %v338_v5 }
  0xd1   : > { %438 = vmatmul.f32.vlgmr.msra.gmra.mxu2 %v404_v8 }
 0x154   : > { %v439_v11 = vpop.f32.mrf.mxu2 }
 0x155   : > { %v442_v12 = vadd.f32 %v439_v11, %v405_v9 }
 0x157   : > { %443 = vst.msk [vmem:[#allocation2] sm:$0xff] %vm299_vm0, %v442_v12 }
 0x15e   : > { %v447_v13 = vld [vmem:[#allocation2] sm:$0xff] }
 0x15f   : > { %v452_v14 = vadd.f32 %v652_v10, %v447_v13 }
 0x161   : > { %453 = vst.msk [vmem:[%s273_s10] sm:$0xff] %vm299_vm0, %v452_v14 }
 0x162   : > { %682 = shalt.err (!%p679_p5)
}
 0x163   : > { %596 = dma.vmem_to_hbm [thread:$0]  (%p806_p4), %s468_s11, 128, %s470_s12, %s455_s21  }
 0x164 PF: > { %p602_p6 = scmp.ge.s32.totalorder %s733_s23, 2  ;;  %s481_s17 = sand.u32 1, %s713_s18  }
 0x165   : > { %s482_s29 = scalar_lea.sflag [#allocation4], %s481_s17 }
 0x166   : > { %p599_p7 = pnand %p602_p6, %p813_p8 }
 0x168   : > { %p600_p9 = pneg %p599_p7 }
 0x16a   : > { %708 = dma.done.wait (%p600_p9), %s482_s29, 128  }
 0x16b   : > { %710 = vsyncadd (%p600_p9), %s482_s29, 4294967168  ;;  %s18_s23 = sadd.s32 1, %s733_s23   ;;  %s962_s18 = smov %s717_s19 }
 0x16c   : > { %p15_p10 = scmp.ge.s32.totalorder %s18_s23, 4   ;;  %s963_s19 = smov %s721_s20 }
 0x16d   : > { %s964_s20 = smov %s819_s6  ;;  %s965_s21 = smov %s729_s22 }
 0x16e   : > { %s966_s22 = smov %s968_s26  ;;  %17 = sbr.rel (!%p15_p10) target bundleno = 4 (0x4), region = 92 }
 0x173   :  { %488 = vsyncpa [#allocation4], 1 }
 0x174   :  { %490 = vsyncpa [#allocation4 + $0x1], 1 }

</bundles_post_ra>
